<compile_context>
chip_gen: v7x
topology: tpu7x:2x2x1
jax: 0.10.0
libtpu: 0.0.40
codegen_flags: <defaults>
</compile_context>

<pallas_src>
import math
import functools

import jax
import jax.numpy as jnp
from jax import lax
from jax.experimental import pallas as pl
from jax.experimental.pallas import tpu as pltpu


_DMA_WINDOW = 16  # outstanding row DMAs per tile (power of two, one sem each)


def _embedding_gather_kernel(ids_ref, table_ref, out_ref, row_slab, sem, *, scale):
    """Gather + scale one tile of flattened tokens.

    ids_ref:   SMEM (n_pad,) int32   -- all token ids (scalar prefetched)
    table_ref: HBM  (V, D)           -- embedding table, never copied whole
    out_ref:   VMEM (TN, D)          -- scaled embeddings for this tile
    row_slab:  VMEM (TN, D) scratch  -- DMA landing buffer
    sem:       DMA semaphores (_DMA_WINDOW,)
    """
    tn = out_ref.shape[0]
    base = pl.program_id(0) * tn

    def row_copy(dst_row, src_row, slot):
        return pltpu.make_async_copy(
            table_ref.at[pl.ds(src_row, 1), :],
            row_slab.at[pl.ds(dst_row, 1), :],
            sem.at[slot],
        )

    # Rolling window of outstanding row DMAs: before reusing a semaphore slot,
    # retire the copy that previously used it.  Keeps up to _DMA_WINDOW DMAs in
    # flight so the DMA engine stays busy while the scalar core issues more.
    def issue(j, carry):
        slot = j & (_DMA_WINDOW - 1)

        @pl.when(j >= _DMA_WINDOW)
        def _():
            row_copy(j - _DMA_WINDOW, 0, slot).wait()

        row_copy(j, ids_ref[base + j], slot).start()
        return carry

    lax.fori_loop(0, tn, issue, 0)

    # Drain the last window of copies.
    def drain(j, carry):
        row_copy(j, 0, j & (_DMA_WINDOW - 1)).wait()
        return carry

    lax.fori_loop(max(tn - _DMA_WINDOW, 0), tn, drain, 0)

    # Single cheap VPU pass applies the sqrt(D) scale (hidden under the DMAs of
    # the neighboring pipeline stages).
    out_ref[...] = row_slab[...] * scale


def embedding_forward(ids, table, *, token_tile=512):
    """ids: (B, S) int, table: (V, D) -> (B, S, D) == table[ids] * sqrt(D)."""
    assert ids.ndim == 2 and table.ndim == 2
    B, S = ids.shape
    V, D = table.shape
    N = B * S
    dtype = table.dtype
    itemsize = jnp.dtype(dtype).itemsize

    # Large token tiles amortize the ~0.35us/grid-step overhead; clamp for tiny
    # inputs and keep a multiple of 8 (sublanes).
    token_tile = int(min(token_tile, -(-N // 8) * 8))
    token_tile = max(8, (token_tile // 8) * 8)

    # Pad flattened token count up to a multiple of the tile.  Padded ids are 0
    # (a valid row); their output rows are sliced off below.
    n_pad = -(-N // token_tile) * token_tile
    ids_flat = ids.reshape(-1).astype(jnp.int32)
    if n_pad != N:
        ids_flat = jnp.pad(ids_flat, (0, n_pad - N))

    scale = math.sqrt(D)
    kernel = functools.partial(_embedding_gather_kernel, scale=scale)

    # Memory-bound gather: ~zero flops; bytes = ids + per-token row reads + output.
    cost = pl.CostEstimate(
        flops=n_pad * D,                      # just the scale multiply
        transcendentals=0,
        bytes_accessed=n_pad * 4 + 2 * n_pad * D * itemsize,
    )

    out_flat = pl.pallas_call(
        kernel,
        out_shape=jax.ShapeDtypeStruct((n_pad, D), dtype),
        grid_spec=pltpu.PrefetchScalarGridSpec(
            num_scalar_prefetch=1,                      # ids -> SMEM
            grid=(n_pad // token_tile,),
            in_specs=[pl.BlockSpec(memory_space=pl.ANY)],  # table stays in HBM
            out_specs=pl.BlockSpec((token_tile, D), lambda i, ids: (i, 0)),
            scratch_shapes=[
                pltpu.VMEM((token_tile, D), dtype),
                pltpu.SemaphoreType.DMA((_DMA_WINDOW,)),
            ],
        ),
        compiler_params=pltpu.CompilerParams(
            # Independent token tiles -> megacore-shardable on v7x.
            dimension_semantics=("parallel",),
            # Footprint is only the output double-buffer + one slab (< 1 MiB at
            # 512x128 f32); 32 MiB is safely within every generation's VMEM.
            vmem_limit_bytes=32 * 1024 * 1024,
        ),
        cost_estimate=cost,
    )(ids_flat, table)

    return out_flat[:N].reshape(B, S, D)


if __name__ == "__main__":
    # Small deterministic setup consistent with the module's forward:
    # ids (batch, seq) -> (batch, seq, embed_vec_len).  N = 640 -> two 512-token
    # tiles, so both the multi-tile path and tail padding are exercised.
    vocab_size = 64
    embed_vec_len = 128
    batch, seq = 4, 160

    key = jax.random.PRNGKey(0)
    k_table, k_ids = jax.random.split(key)

    # nn.Embedding weight init ~ N(0, 1); synthetic deterministic parameters.
    table = jax.random.normal(k_table, (vocab_size, embed_vec_len), dtype=jnp.float32)
    ids = jax.random.randint(k_ids, (batch, seq), 0, vocab_size, dtype=jnp.int32)

    out = jax.block_until_ready(embedding_forward(ids, table))

    # Reference check against plain JAX gather (PyTorch semantics).
    ref = table[ids] * math.sqrt(embed_vec_len)
    assert out.shape == (batch, seq, embed_vec_len)
    assert jnp.allclose(out, ref, atol=1e-5, rtol=1e-5)

    print("KERNEL_OK")
</pallas_src>

<mosaic_0001>
module attributes {stable_mosaic.version = 11 : i64} {
  func.func @_embedding_gather_kernel(%arg0: i32, %arg1: memref<1024xi32, #tpu.memory_space<smem>>, %arg2: memref<64x128xf32, #tpu.memory_space<any>>, %arg3: memref<512x128xf32, #tpu.memory_space<vmem>>, %arg4: memref<512x128xf32, #tpu.memory_space<vmem>>, %arg5: memref<16x!tpu.dma_semaphore, #tpu.memory_space<semaphore_mem>>) attributes {dimension_semantics = [#tpu.dimension_semantics<parallel>], iteration_bounds = array<i64: 2>, scalar_prefetch = 1 : i64, scratch_operands = 2 : i64, tpu.core_type = #tpu.core_type<tc>, window_params = [{}, {transform_indices = @transform_1, window_bounds = array<i64: 512, 128>}]} {
    %c512_i32 = arith.constant 512 : i32
    %0 = arith.muli %arg0, %c512_i32 : i32
    %c0_i32 = arith.constant 0 : i32
    %c512_i32_0 = arith.constant 512 : i32
    %1 = arith.addi %c0_i32, %c512_i32_0 : i32
    %c1_i32 = arith.constant 1 : i32
    scf.for %arg6 = %c0_i32 to %1 step %c1_i32  : i32 {
      %c15_i32 = arith.constant 15 : i32
      %7 = arith.andi %arg6, %c15_i32 : i32
      %c16_i32_7 = arith.constant 16 : i32
      %8 = arith.cmpi sge, %arg6, %c16_i32_7 : i32
      %9 = arith.extui %8 : i1 to i32
      %c0_i32_8 = arith.constant 0 : i32
      %10 = arith.cmpi ne, %9, %c0_i32_8 : i32
      scf.if %10 {
        %c16_i32_11 = arith.constant 16 : i32
        %18 = arith.subi %arg6, %c16_i32_11 : i32
        %c0_i32_12 = arith.constant 0 : i32
        %c0_i32_13 = arith.constant 0 : i32
        %19 = tpu.memref_slice %arg2[%c0_i32_12, %c0_i32_13] : memref<64x128xf32, #tpu.memory_space<any>> -> memref<1x128xf32, #tpu.memory_space<any>>
        %c0_i32_14 = arith.constant 0 : i32
        %20 = tpu.memref_slice %arg4[%18, %c0_i32_14] : memref<512x128xf32, #tpu.memory_space<vmem>> -> memref<1x128xf32, #tpu.memory_space<vmem>>
        %21 = tpu.memref_slice %arg5[%7] : memref<16x!tpu.dma_semaphore, #tpu.memory_space<semaphore_mem>> -> memref<1x!tpu.dma_semaphore, #tpu.memory_space<semaphore_mem>>
        %22 = tpu.memref_squeeze %21 : memref<1x!tpu.dma_semaphore, #tpu.memory_space<semaphore_mem>> -> memref<!tpu.dma_semaphore, #tpu.memory_space<semaphore_mem>>
        tpu.wait_dma2 semaphore(%22 : memref<!tpu.dma_semaphore, #tpu.memory_space<semaphore_mem>>) src(%19 : memref<1x128xf32, #tpu.memory_space<any>>) dst(%20 : memref<1x128xf32, #tpu.memory_space<vmem>>)
      } else {
      }
      %11 = arith.addi %0, %arg6 : i32
      %12 = arith.index_cast %11 : i32 to index
      %13 = memref.load %arg1[%12] : memref<1024xi32, #tpu.memory_space<smem>>
      %c0_i32_9 = arith.constant 0 : i32
      %14 = tpu.memref_slice %arg2[%13, %c0_i32_9] : memref<64x128xf32, #tpu.memory_space<any>> -> memref<1x128xf32, #tpu.memory_space<any>>
      %c0_i32_10 = arith.constant 0 : i32
      %15 = tpu.memref_slice %arg4[%arg6, %c0_i32_10] : memref<512x128xf32, #tpu.memory_space<vmem>> -> memref<1x128xf32, #tpu.memory_space<vmem>>
      %16 = tpu.memref_slice %arg5[%7] : memref<16x!tpu.dma_semaphore, #tpu.memory_space<semaphore_mem>> -> memref<1x!tpu.dma_semaphore, #tpu.memory_space<semaphore_mem>>
      %17 = tpu.memref_squeeze %16 : memref<1x!tpu.dma_semaphore, #tpu.memory_space<semaphore_mem>> -> memref<!tpu.dma_semaphore, #tpu.memory_space<semaphore_mem>>
      tpu.enqueue_dma source(%14 : memref<1x128xf32, #tpu.memory_space<any>>) target(%15 : memref<1x128xf32, #tpu.memory_space<vmem>>) target_semaphore(%17 : memref<!tpu.dma_semaphore, #tpu.memory_space<semaphore_mem>>)
    }
    %c512_i32_1 = arith.constant 512 : i32
    %c496_i32 = arith.constant 496 : i32
    %c16_i32 = arith.constant 16 : i32
    %2 = arith.addi %c496_i32, %c16_i32 : i32
    %c1_i32_2 = arith.constant 1 : i32
    scf.for %arg6 = %c496_i32 to %2 step %c1_i32_2  : i32 {
      %c15_i32 = arith.constant 15 : i32
      %7 = arith.andi %arg6, %c15_i32 : i32
      %c0_i32_7 = arith.constant 0 : i32
      %c0_i32_8 = arith.constant 0 : i32
      %8 = tpu.memref_slice %arg2[%c0_i32_7, %c0_i32_8] : memref<64x128xf32, #tpu.memory_space<any>> -> memref<1x128xf32, #tpu.memory_space<any>>
      %c0_i32_9 = arith.constant 0 : i32
      %9 = tpu.memref_slice %arg4[%arg6, %c0_i32_9] : memref<512x128xf32, #tpu.memory_space<vmem>> -> memref<1x128xf32, #tpu.memory_space<vmem>>
      %10 = tpu.memref_slice %arg5[%7] : memref<16x!tpu.dma_semaphore, #tpu.memory_space<semaphore_mem>> -> memref<1x!tpu.dma_semaphore, #tpu.memory_space<semaphore_mem>>
      %11 = tpu.memref_squeeze %10 : memref<1x!tpu.dma_semaphore, #tpu.memory_space<semaphore_mem>> -> memref<!tpu.dma_semaphore, #tpu.memory_space<semaphore_mem>>
      tpu.wait_dma2 semaphore(%11 : memref<!tpu.dma_semaphore, #tpu.memory_space<semaphore_mem>>) src(%8 : memref<1x128xf32, #tpu.memory_space<any>>) dst(%9 : memref<1x128xf32, #tpu.memory_space<vmem>>)
    }
    %c16_i32_3 = arith.constant 16 : i32
    %c0 = arith.constant 0 : index
    %c0_4 = arith.constant 0 : index
    %3 = vector.load %arg4[%c0, %c0_4] : memref<512x128xf32, #tpu.memory_space<vmem>>, vector<512x128xf32>
    %cst = arith.constant 11.3137083 : f32
    %4 = vector.broadcast %cst : f32 to vector<512x128xf32>
    %5 = arith.mulf %3, %4 : vector<512x128xf32>
    %c0_5 = arith.constant 0 : index
    %c0_6 = arith.constant 0 : index
    %6 = vector.load %arg3[%c0_5, %c0_6] : memref<512x128xf32, #tpu.memory_space<vmem>>, vector<512x128xf32>
    tpu.vector_store %arg3[%c0_5, %c0_6], %5 {strides = array<i32>} : memref<512x128xf32, #tpu.memory_space<vmem>>, vector<512x128xf32>,
    return
  }
  func.func @transform_1(%arg0: i32, %arg1: memref<1024xi32, #tpu.memory_space<smem>>) -> (i32, i32) {
    %c0_i32 = arith.constant 0 : i32
    %c0_i32_0 = arith.constant 0 : i32
    return %arg0, %c0_i32 : i32, i32
  }
}

</mosaic_0001>

<bundles_post_ra>
// kernel: tpu_custom_call.1
= control target key start
LH: loop header
LB: loop body
LE: loop exit
PB: predicated region body
PF: predicated region fallthrough
CT: control target
= control target key end

     0   :  { %s888_s0 = inlined_call_operand.hbm [shape: s32[1024], index: 0, kind: input, shape index: {}]   ;;  %s889_s1 = inlined_call_operand.hbm [shape: f32[64,128], index: 1, kind: input, shape index: {}]   ;;  %s890_s2 = inlined_call_operand.hbm [shape: f32[1024,128], index: 2, kind: output, shape index: {}]  }
   0x1   :  { %s558_s11 = scalar_lea.hbm %s888_s0, 128 }
   0x2   :  { %p559_p0 = scmp.ne.s32.totalorder %s888_s0, %s558_s11  ;;  %p562_p1 = scmp.lt.u32.totalorder %s558_s11, %s888_s0 }
   0x4   :  { %p564_p2 = pnand %p562_p1, %p559_p0 }
   0x6   :  { %567 = shalt.err (!%p564_p2)  }
   0x7   :  { %s672_s16 = smov [#allocation5]  }
   0x8   :  { %8 = dma.hbm_to_smem %s888_s0, 128, %s672_s16, [#allocation4] }
   0x9   :  { %640 = dma.done.wait [#allocation4], 128 }
   0xa   :  { %641 = vsyncadd [#allocation4], 4294967168 }
   0xb   :  { %10 = sfence }
   0xc   :  { %11 = vsyncpa [#allocation7], 0 }
   0xd   :  { %13 = vsyncpa [#allocation7 + $0x1], 0  ;;  %s704_s19 = smov 0   ;;  %s706_s20 = smov 0  }
   0xe   :  { %s708_s21 = smov 0  }
   0xf LB: > { %s476_s0 = sadd.s32 4294967295, %s662_s21   ;;  %s721_s22 = sadd.s32 1, %s662_s21   ;;  %s662_s21 = sphi %s708_s21, %s895_s21   ;;  %s658_s20 = sphi %s706_s20, %s894_s20   ;;  %s654_s19 = sphi %s704_s19, %s893_s19  }
  0x10   : > { %s22_s23 = ssub.s32 %s662_s21, %s721_s22  ;;  %s25_s24 = sadd.s32 1, %s658_s20 }
  0x11   : > { %p23_p3 = scmp.eq.s32.totalorder %s22_s23, 0  ;;  %p477_p4 = scmp.ne.s32.totalorder %s22_s23, 0 }
  0x12   : > { %p29_p5 = scmp.eq.s32.totalorder %s662_s21, 1  ;;  %p34_p6 = scmp.ne.s32.totalorder %s658_s20, %s654_s19 }
  0x13   : > { %s730_s25 = scalar_select %p23_p3, %s658_s20, %s25_s24  }
  0x14   : > { %p732_p7 = por %p477_p4, %p29_p5  ;;  %p35_p8 = scmp.eq.s32.totalorder %s476_s0, 1 }
  0x15   : > { %p478_p10 = scmp.ge.s32.totalorder %s662_s21, 2 }
  0x16   : > { %p736_p9 = por %p35_p8, %p34_p6  ;;  %s49_s28 = sand.u32 (!%p478_p10), 1, %s658_s20  }
  0x17   : > { %44 = sbr.rel (%p478_p10) target bundleno = 142 (0x8e), region = 12  ;;  %s480_s29 = sshll.u32 (!%p478_p10), %s662_s21, 9 }
  0x18   : > { %s479_s30 = sshll.u32 (!%p478_p10), %s49_s28, 9  ;;  %s747_s4 = smov (!%p478_p10), 0  }
  0x19   : > { %s745_s3 = scalar_lea.vmem (!%p478_p10), [#allocation6], %s479_s30 }
  0x1e LB: >> { %s60_s5 = sand.u32 15, %s666_s4  ;;  %p513_p11 = scmp.ge.s32.totalorder %s666_s4, 16  ;;  %s666_s4 = sphi %s747_s4, %s59_s4  }
  0x1f   : >> { %s754_s6 = scalar_lea.sflag [#allocation3], %s60_s5 }
  0x20   : >> { %643 = dma.done.wait (%p513_p11), %s754_s6, 16 }
  0x21   : >> { %645 = vsyncadd (%p513_p11), %s754_s6, 4294967280  ;;  %s69_s7 = sadd.s32 %s666_s4, %s480_s29  ;;  %s73_s9 = scalar_lea.vmem [#allocation2], %s666_s4 }
  0x22   : >> { %s70_s8 = sld [smem:[#allocation5 + %s69_s7]]  ;;  %s82_s10 = sshll.u32 %s73_s9, 4  ;;  %s83_s10 = int_to_ptr.vmem [resolvable:$true] %s82_s10 }
  0x23   : >> { %s570_s18 = scalar_lea.hbm %s889_s1, 1024 }
  0x28   : >> { %s482_s11 = sshll.u32 %s70_s8, 4 }
  0x29   : >> { %s72_s14 = scalar_lea.hbm %s889_s1, %s482_s11 }
  0x2a   : >> { %s568_s15 = scalar_lea.hbm %s72_s14, 16  ;;  %p571_p13 = scmp.lt.u32.totalorder %s72_s14, %s889_s1 }
  0x2b   : >> { %p569_p12 = scmp.ne.s32.totalorder %s72_s14, %s568_s15  ;;  %p572_p0 = scmp.lt.u32.totalorder %s570_s18, %s568_s15 }
  0x2c   : >> { %p574_p2 = scmp.lt.u32.totalorder %s568_s15, %s72_s14 }
  0x2d   : >> { %p573_p1 = por %p572_p0, %p571_p13 }
  0x2f   : >> { %p575_p3 = por %p574_p2, %p573_p1 }
  0x31   : >> { %p576_p4 = pnand %p575_p3, %p569_p12 }
  0x33   : >> { %579 = shalt.err (!%p576_p4)  }
  0x34   : >> { %s580_s24 = scalar_lea.vmem %s83_s10, 16  ;;  %s673_s30 = smov [#allocation2]  }
  0x35   : >> { %p581_p5 = scmp.ne.s32.totalorder %s83_s10, %s580_s24  ;;  %s582_s5 = sshll.u32 %s673_s30, 4  ;;  %s583_s5 = int_to_ptr.vmem [resolvable:$false] %s582_s5 }
  0x36   : >> { %s584_s7 = scalar_lea.vmem %s583_s5, 8192  ;;  %p585_p6 = scmp.lt.s32.totalorder %s83_s10, %s583_s5 }
  0x37   : >> { %p586_p8 = scmp.lt.s32.totalorder %s584_s7, %s580_s24 }
  0x39   : >> { %p587_p10 = por %p586_p8, %p585_p6 }
  0x3b   : >> { %p588_p11 = pnand %p587_p10, %p581_p5 }
  0x3d   : >> { %591 = shalt.err (!%p588_p11)  }
  0x3e   : >> { %85 = dma.hbm_to_vmem [thread:$0]  %s72_s14, 16, %s83_s10, %s754_s6 }
  0x3f   : >> { %s59_s4 = sadd.s32 1, %s666_s4  }
  0x40   : >> { %p56_p13 = scmp.ge.s32.totalorder %s59_s4, 512  }
  0x41   : > { %s668_s8 = smov (%p56_p13), 496  }
  0x42   : > { %58 = sbr.rel (!%p56_p13) target bundleno = 30 (0x1e), region = 86 }
  0x49 LB: >> { %s92_s9 = sand.u32 15, %s670_s8  ;;  %s670_s8 = sphi %s668_s8, %s91_s8  }
  0x4a   : >> { %s93_s11 = scalar_lea.sflag [#allocation3], %s92_s9 }
  0x4b   : >> { %646 = dma.done.wait %s93_s11, 16 }
  0x4c   : >> { %647 = vsyncadd %s93_s11, 4294967280  ;;  %s91_s8 = sadd.s32 1, %s670_s8  }
  0x4d   : >> { %p88_p12 = scmp.ge.s32.totalorder %s91_s8, 512  }
  0x4e   : > { %v97_v0 = vld [vmem:[#allocation2] sm:$0xff] (%p88_p12)  ;;  %v98_v1 = vld [vmem:[#allocation2 + $0x8] sm:$0xff] (%p88_p12)  ;;  %v99_v2 = vld [vmem:[#allocation2 + $0x10] sm:$0xff] (%p88_p12)  ;;  %s504_s29 = sshll.u32 (%p88_p12), %s662_s21, 13  ;;  %s303_s4 = sshll.u32 (%p88_p12), %s745_s3, 4  ;;  %s845_s4 = int_to_ptr.vmem [resolvable:$true] %s303_s4 }
  0x4f   : > { %90 = sbr.rel (!%p88_p12) target bundleno = 73 (0x49), region = 97  ;;  %v161_v3 = vmul.f32 (%p88_p12), 11.313708, %v97_v0  ;;  %v162_v4 = vmul.f32 (%p88_p12), 11.313708, %v98_v1  ;;  %v100_v6 = vld [vmem:[#allocation2 + $0x18] sm:$0xff] (%p88_p12)  ;;  %s840_s12 = scalar_lea.hbm (%p88_p12), %s890_s2, %s504_s29 }
  0x50   : > { %v163_v5 = vmul.f32 (%p88_p12), 11.313708, %v99_v2  ;;  %v101_v7 = vld [vmem:[#allocation2 + $0x20] sm:$0xff] (%p88_p12)  ;;  %v102_v8 = vld [vmem:[#allocation2 + $0x28] sm:$0xff] (%p88_p12)  ;;  %v164_v9 = vmul.f32 (%p88_p12), 11.313708, %v100_v6 }
  0x51   : > { %225 = vst [vmem:[%s745_s3] sm:$0xff] (%p88_p12), %v161_v3  ;;  %226 = vst [vmem:[%s745_s3 + $0x8] sm:$0xff] (%p88_p12), %v162_v4  ;;  %v165_v10 = vmul.f32 (%p88_p12), 11.313708, %v101_v7  ;;  %v166_v11 = vmul.f32 (%p88_p12), 11.313708, %v102_v8  ;;  %v103_v12 = vld [vmem:[#allocation2 + $0x30] sm:$0xff] (%p88_p12) }
  0x52   : > { %227 = vst [vmem:[%s745_s3 + $0x10] sm:$0xff] (%p88_p12), %v163_v5  ;;  %v104_v13 = vld [vmem:[#allocation2 + $0x38] sm:$0xff] (%p88_p12)  ;;  %v105_v14 = vld [vmem:[#allocation2 + $0x40] sm:$0xff] (%p88_p12)  ;;  %228 = vst [vmem:[%s745_s3 + $0x18] sm:$0xff] (%p88_p12), %v164_v9  ;;  %v167_v15 = vmul.f32 (%p88_p12), 11.313708, %v103_v12 }
  0x53   : > { %229 = vst [vmem:[%s745_s3 + $0x20] sm:$0xff] (%p88_p12), %v165_v10  ;;  %230 = vst [vmem:[%s745_s3 + $0x28] sm:$0xff] (%p88_p12), %v166_v11  ;;  %v168_v16 = vmul.f32 (%p88_p12), 11.313708, %v104_v13  ;;  %v169_v17 = vmul.f32 (%p88_p12), 11.313708, %v105_v14 }
  0x54   : > { %v106_v18 = vld [vmem:[#allocation2 + $0x48] sm:$0xff] (%p88_p12)  ;;  %v107_v19 = vld [vmem:[#allocation2 + $0x50] sm:$0xff] (%p88_p12)  ;;  %v108_v20 = vld [vmem:[#allocation2 + $0x58] sm:$0xff] (%p88_p12)  ;;  %231 = vst [vmem:[%s745_s3 + $0x30] sm:$0xff] (%p88_p12), %v167_v15  ;;  %s850_s13 = scalar_lea.sflag (%p88_p12), [#allocation7], %s49_s28  ;;  %s592_s14 = scalar_lea.vmem (%p88_p12), %s845_s4, 8192 }
  0x55   : > { %232 = vst [vmem:[%s745_s3 + $0x38] sm:$0xff] (%p88_p12), %v168_v16  ;;  %233 = vst [vmem:[%s745_s3 + $0x40] sm:$0xff] (%p88_p12), %v169_v17  ;;  %v170_v21 = vmul.f32 (%p88_p12), 11.313708, %v106_v18  ;;  %v171_v22 = vmul.f32 (%p88_p12), 11.313708, %v107_v19  ;;  %p593_p0 = scmp.ne.s32.totalorder (%p88_p12), %s845_s4, %s592_s14 }
  0x56   : > { %v172_v23 = vmul.f32 11.313708, %v108_v20  ;;  %v109_v24 = vld [vmem:[#allocation2 + $0x60] sm:$0xff]  ;;  %v110_v25 = vld [vmem:[#allocation2 + $0x68] sm:$0xff]  ;;  %v111_v26 = vld [vmem:[#allocation2 + $0x70] sm:$0xff]  ;;  %s674_s15 = smov [#allocation6]  }
  0x57   : > { %234 = vst [vmem:[%s745_s3 + $0x48] sm:$0xff] %v170_v21  ;;  %235 = vst [vmem:[%s745_s3 + $0x50] sm:$0xff] %v171_v22  ;;  %v173_v27 = vmul.f32 11.313708, %v109_v24  ;;  %v174_v28 = vmul.f32 11.313708, %v110_v25  ;;  %p594_p1 = pnand %p593_p0, %p732_p7 }
  0x58   : > { %236 = vst [vmem:[%s745_s3 + $0x58] sm:$0xff] %v172_v23  ;;  %v175_v29 = vmul.f32 11.313708, %v111_v26  ;;  %v112_v30 = vld [vmem:[#allocation2 + $0x78] sm:$0xff]  ;;  %v113_v31 = vld [vmem:[#allocation2 + $0x80] sm:$0xff]  ;;  %v114_v32 = vld [vmem:[#allocation2 + $0x88] sm:$0xff] }
  0x59   : > { %237 = vst [vmem:[%s745_s3 + $0x60] sm:$0xff] %v173_v27  ;;  %238 = vst [vmem:[%s745_s3 + $0x68] sm:$0xff] %v174_v28  ;;  %v176_v33 = vmul.f32 11.313708, %v112_v30  ;;  %v177_v34 = vmul.f32 11.313708, %v113_v31  ;;  %p595_p2 = pneg %p594_p1 }
  0x5a   : > { %239 = vst [vmem:[%s745_s3 + $0x70] sm:$0xff] %v175_v29  ;;  %v178_v35 = vmul.f32 11.313708, %v114_v32  ;;  %v115_v36 = vld [vmem:[#allocation2 + $0x90] sm:$0xff]  ;;  %v116_v37 = vld [vmem:[#allocation2 + $0x98] sm:$0xff]  ;;  %v117_v38 = vld [vmem:[#allocation2 + $0xa0] sm:$0xff] }
  0x5b   : > { %240 = vst [vmem:[%s745_s3 + $0x78] sm:$0xff] %v176_v33  ;;  %241 = vst [vmem:[%s745_s3 + $0x80] sm:$0xff] %v177_v34  ;;  %v179_v39 = vmul.f32 11.313708, %v115_v36  ;;  %v180_v40 = vmul.f32 11.313708, %v116_v37 }
  0x5c   : > { %242 = vst [vmem:[%s745_s3 + $0x88] sm:$0xff] %v178_v35  ;;  %v181_v41 = vmul.f32 11.313708, %v117_v38  ;;  %v118_v42 = vld [vmem:[#allocation2 + $0xa8] sm:$0xff]  ;;  %v119_v43 = vld [vmem:[#allocation2 + $0xb0] sm:$0xff]  ;;  %v120_v44 = vld [vmem:[#allocation2 + $0xb8] sm:$0xff] }
  0x5d   : > { %243 = vst [vmem:[%s745_s3 + $0x90] sm:$0xff] %v179_v39  ;;  %244 = vst [vmem:[%s745_s3 + $0x98] sm:$0xff] %v180_v40  ;;  %v182_v45 = vmul.f32 11.313708, %v118_v42  ;;  %v183_v46 = vmul.f32 11.313708, %v119_v43 }
  0x5e   : > { %245 = vst [vmem:[%s745_s3 + $0xa0] sm:$0xff] %v181_v41  ;;  %v184_v47 = vmul.f32 11.313708, %v120_v44  ;;  %v121_v48 = vld [vmem:[#allocation2 + $0xc0] sm:$0xff]  ;;  %v122_v49 = vld [vmem:[#allocation2 + $0xc8] sm:$0xff]  ;;  %v123_v50 = vld [vmem:[#allocation2 + $0xd0] sm:$0xff] }
  0x5f   : > { %246 = vst [vmem:[%s745_s3 + $0xa8] sm:$0xff] %v182_v45  ;;  %247 = vst [vmem:[%s745_s3 + $0xb0] sm:$0xff] %v183_v46  ;;  %v185_v51 = vmul.f32 11.313708, %v121_v48  ;;  %v186_v52 = vmul.f32 11.313708, %v122_v49 }
  0x60   : > { %248 = vst [vmem:[%s745_s3 + $0xb8] sm:$0xff] %v184_v47  ;;  %v187_v53 = vmul.f32 11.313708, %v123_v50  ;;  %v124_v54 = vld [vmem:[#allocation2 + $0xd8] sm:$0xff]  ;;  %v125_v55 = vld [vmem:[#allocation2 + $0xe0] sm:$0xff]  ;;  %v126_v56 = vld [vmem:[#allocation2 + $0xe8] sm:$0xff] }
  0x61   : > { %249 = vst [vmem:[%s745_s3 + $0xc0] sm:$0xff] %v185_v51  ;;  %250 = vst [vmem:[%s745_s3 + $0xc8] sm:$0xff] %v186_v52  ;;  %v188_v57 = vmul.f32 11.313708, %v124_v54  ;;  %v189_v58 = vmul.f32 11.313708, %v125_v55 }
  0x62   : > { %251 = vst [vmem:[%s745_s3 + $0xd0] sm:$0xff] %v187_v53  ;;  %v190_v59 = vmul.f32 11.313708, %v126_v56  ;;  %v127_v60 = vld [vmem:[#allocation2 + $0xf0] sm:$0xff]  ;;  %v128_v61 = vld [vmem:[#allocation2 + $0xf8] sm:$0xff]  ;;  %v129_v62 = vld [vmem:[#allocation2 + $0x100] sm:$0xff] }
  0x63   : > { %252 = vst [vmem:[%s745_s3 + $0xd8] sm:$0xff] %v188_v57  ;;  %253 = vst [vmem:[%s745_s3 + $0xe0] sm:$0xff] %v189_v58  ;;  %v191_v63 = vmul.f32 11.313708, %v127_v60  ;;  %v192_v0 = vmul.f32 11.313708, %v128_v61 }
  0x64   : > { %254 = vst [vmem:[%s745_s3 + $0xe8] sm:$0xff] %v190_v59  ;;  %v193_v1 = vmul.f32 11.313708, %v129_v62  ;;  %v130_v2 = vld [vmem:[#allocation2 + $0x108] sm:$0xff]  ;;  %v131_v3 = vld [vmem:[#allocation2 + $0x110] sm:$0xff]  ;;  %v132_v4 = vld [vmem:[#allocation2 + $0x118] sm:$0xff] }
  0x65   : > { %255 = vst [vmem:[%s745_s3 + $0xf0] sm:$0xff] %v191_v63  ;;  %256 = vst [vmem:[%s745_s3 + $0xf8] sm:$0xff] %v192_v0  ;;  %v194_v5 = vmul.f32 11.313708, %v130_v2  ;;  %v195_v6 = vmul.f32 11.313708, %v131_v3 }
  0x66   : > { %257 = vst [vmem:[%s745_s3 + $0x100] sm:$0xff] %v193_v1  ;;  %v196_v7 = vmul.f32 11.313708, %v132_v4  ;;  %v133_v8 = vld [vmem:[#allocation2 + $0x120] sm:$0xff]  ;;  %v134_v9 = vld [vmem:[#allocation2 + $0x128] sm:$0xff]  ;;  %v135_v10 = vld [vmem:[#allocation2 + $0x130] sm:$0xff] }
  0x67   : > { %258 = vst [vmem:[%s745_s3 + $0x108] sm:$0xff] %v194_v5  ;;  %259 = vst [vmem:[%s745_s3 + $0x110] sm:$0xff] %v195_v6  ;;  %v197_v11 = vmul.f32 11.313708, %v133_v8  ;;  %v198_v12 = vmul.f32 11.313708, %v134_v9 }
  0x68   : > { %260 = vst [vmem:[%s745_s3 + $0x118] sm:$0xff] %v196_v7  ;;  %v199_v13 = vmul.f32 11.313708, %v135_v10  ;;  %v136_v14 = vld [vmem:[#allocation2 + $0x138] sm:$0xff]  ;;  %v137_v15 = vld [vmem:[#allocation2 + $0x140] sm:$0xff]  ;;  %v138_v16 = vld [vmem:[#allocation2 + $0x148] sm:$0xff] }
  0x69   : > { %261 = vst [vmem:[%s745_s3 + $0x120] sm:$0xff] %v197_v11  ;;  %262 = vst [vmem:[%s745_s3 + $0x128] sm:$0xff] %v198_v12  ;;  %v200_v17 = vmul.f32 11.313708, %v136_v14  ;;  %v201_v18 = vmul.f32 11.313708, %v137_v15 }
  0x6a   : > { %263 = vst [vmem:[%s745_s3 + $0x130] sm:$0xff] %v199_v13  ;;  %v202_v19 = vmul.f32 11.313708, %v138_v16  ;;  %v139_v20 = vld [vmem:[#allocation2 + $0x150] sm:$0xff]  ;;  %v140_v21 = vld [vmem:[#allocation2 + $0x158] sm:$0xff]  ;;  %v141_v22 = vld [vmem:[#allocation2 + $0x160] sm:$0xff] }
  0x6b   : > { %264 = vst [vmem:[%s745_s3 + $0x138] sm:$0xff] %v200_v17  ;;  %265 = vst [vmem:[%s745_s3 + $0x140] sm:$0xff] %v201_v18  ;;  %v203_v23 = vmul.f32 11.313708, %v139_v20  ;;  %v204_v24 = vmul.f32 11.313708, %v140_v21 }
  0x6c   : > { %266 = vst [vmem:[%s745_s3 + $0x148] sm:$0xff] %v202_v19  ;;  %v205_v25 = vmul.f32 11.313708, %v141_v22  ;;  %v142_v26 = vld [vmem:[#allocation2 + $0x168] sm:$0xff]  ;;  %v143_v27 = vld [vmem:[#allocation2 + $0x170] sm:$0xff]  ;;  %v144_v28 = vld [vmem:[#allocation2 + $0x178] sm:$0xff] }
  0x6d   : > { %267 = vst [vmem:[%s745_s3 + $0x150] sm:$0xff] %v203_v23  ;;  %268 = vst [vmem:[%s745_s3 + $0x158] sm:$0xff] %v204_v24  ;;  %v206_v29 = vmul.f32 11.313708, %v142_v26  ;;  %v207_v30 = vmul.f32 11.313708, %v143_v27 }
  0x6e   : > { %269 = vst [vmem:[%s745_s3 + $0x160] sm:$0xff] %v205_v25  ;;  %v208_v31 = vmul.f32 11.313708, %v144_v28  ;;  %v145_v32 = vld [vmem:[#allocation2 + $0x180] sm:$0xff]  ;;  %v146_v33 = vld [vmem:[#allocation2 + $0x188] sm:$0xff]  ;;  %v147_v34 = vld [vmem:[#allocation2 + $0x190] sm:$0xff] }
  0x6f   : > { %270 = vst [vmem:[%s745_s3 + $0x168] sm:$0xff] %v206_v29  ;;  %271 = vst [vmem:[%s745_s3 + $0x170] sm:$0xff] %v207_v30  ;;  %v209_v35 = vmul.f32 11.313708, %v145_v32  ;;  %v210_v36 = vmul.f32 11.313708, %v146_v33 }
  0x70   : > { %272 = vst [vmem:[%s745_s3 + $0x178] sm:$0xff] %v208_v31  ;;  %v211_v37 = vmul.f32 11.313708, %v147_v34  ;;  %v148_v38 = vld [vmem:[#allocation2 + $0x198] sm:$0xff]  ;;  %v149_v39 = vld [vmem:[#allocation2 + $0x1a0] sm:$0xff]  ;;  %v150_v40 = vld [vmem:[#allocation2 + $0x1a8] sm:$0xff] }
  0x71   : > { %273 = vst [vmem:[%s745_s3 + $0x180] sm:$0xff] %v209_v35  ;;  %274 = vst [vmem:[%s745_s3 + $0x188] sm:$0xff] %v210_v36  ;;  %v212_v41 = vmul.f32 11.313708, %v148_v38  ;;  %v213_v42 = vmul.f32 11.313708, %v149_v39 }
  0x72   : > { %275 = vst [vmem:[%s745_s3 + $0x190] sm:$0xff] %v211_v37  ;;  %v214_v43 = vmul.f32 11.313708, %v150_v40  ;;  %v151_v44 = vld [vmem:[#allocation2 + $0x1b0] sm:$0xff]  ;;  %v152_v45 = vld [vmem:[#allocation2 + $0x1b8] sm:$0xff]  ;;  %v153_v46 = vld [vmem:[#allocation2 + $0x1c0] sm:$0xff] }
  0x73   : > { %276 = vst [vmem:[%s745_s3 + $0x198] sm:$0xff] %v212_v41  ;;  %277 = vst [vmem:[%s745_s3 + $0x1a0] sm:$0xff] %v213_v42  ;;  %v215_v47 = vmul.f32 11.313708, %v151_v44  ;;  %v216_v48 = vmul.f32 11.313708, %v152_v45 }
  0x74   : > { %278 = vst [vmem:[%s745_s3 + $0x1a8] sm:$0xff] %v214_v43  ;;  %v217_v49 = vmul.f32 11.313708, %v153_v46  ;;  %v154_v50 = vld [vmem:[#allocation2 + $0x1c8] sm:$0xff]  ;;  %v155_v51 = vld [vmem:[#allocation2 + $0x1d0] sm:$0xff]  ;;  %v156_v52 = vld [vmem:[#allocation2 + $0x1d8] sm:$0xff] }
  0x75   : > { %279 = vst [vmem:[%s745_s3 + $0x1b0] sm:$0xff] %v215_v47  ;;  %280 = vst [vmem:[%s745_s3 + $0x1b8] sm:$0xff] %v216_v48  ;;  %v218_v53 = vmul.f32 11.313708, %v154_v50  ;;  %v219_v54 = vmul.f32 11.313708, %v155_v51 }
  0x76   : > { %281 = vst [vmem:[%s745_s3 + $0x1c0] sm:$0xff] %v217_v49  ;;  %v220_v55 = vmul.f32 11.313708, %v156_v52  ;;  %v157_v56 = vld [vmem:[#allocation2 + $0x1e0] sm:$0xff]  ;;  %v158_v57 = vld [vmem:[#allocation2 + $0x1e8] sm:$0xff]  ;;  %v159_v58 = vld [vmem:[#allocation2 + $0x1f0] sm:$0xff] }
  0x77   : > { %282 = vst [vmem:[%s745_s3 + $0x1c8] sm:$0xff] %v218_v53  ;;  %283 = vst [vmem:[%s745_s3 + $0x1d0] sm:$0xff] %v219_v54  ;;  %v221_v59 = vmul.f32 11.313708, %v157_v56  ;;  %v222_v60 = vmul.f32 11.313708, %v158_v57 }
  0x78   : > { %284 = vst [vmem:[%s745_s3 + $0x1d8] sm:$0xff] %v220_v55  ;;  %v223_v61 = vmul.f32 11.313708, %v159_v58  ;;  %v160_v62 = vld [vmem:[#allocation2 + $0x1f8] sm:$0xff]  ;;  %s596_s16 = sshll.u32 %s674_s15, 4  ;;  %s597_s16 = int_to_ptr.vmem [resolvable:$false] %s596_s16 }
  0x79   : > { %285 = vst [vmem:[%s745_s3 + $0x1e0] sm:$0xff] %v221_v59  ;;  %286 = vst [vmem:[%s745_s3 + $0x1e8] sm:$0xff] %v222_v60  ;;  %v224_v63 = vmul.f32 11.313708, %v160_v62  ;;  %s598_s17 = scalar_lea.vmem %s597_s16, 16384  ;;  %p599_p3 = scmp.lt.s32.totalorder %s845_s4, %s597_s16 }
  0x7a   : > { %287 = vst [vmem:[%s745_s3 + $0x1f0] sm:$0xff] %v223_v61  ;;  %p600_p4 = scmp.lt.s32.totalorder %s598_s17, %s592_s14 }
  0x7b   : > { %288 = vst [vmem:[%s745_s3 + $0x1f8] sm:$0xff] %v224_v63 }
  0x7c   : > { %p601_p5 = por %p600_p4, %p599_p3 }
  0x7e   : > { %p602_p6 = pnand %p601_p5, %p595_p2 }
  0x80   : > { %605 = shalt.err (!%p602_p6)
}
  0x81   : > { %s606_s28 = scalar_lea.hbm %s840_s12, 8192  ;;  %s610_s0 = scalar_lea.hbm %s890_s2, 16384 }
  0x82   : > { %p607_p8 = scmp.ne.s32.totalorder %s840_s12, %s606_s28  ;;  %p611_p13 = scmp.lt.u32.totalorder %s840_s12, %s890_s2 }
  0x83   : > { %p612_p12 = scmp.lt.u32.totalorder %s610_s0, %s606_s28  ;;  %p614_p1 = scmp.lt.u32.totalorder %s606_s28, %s840_s12 }
  0x84   : > { %p608_p10 = pnand %p607_p8, %p732_p7 }
  0x85   : > { %p613_p0 = por %p612_p12, %p611_p13 }
  0x86   : > { %p609_p11 = pneg %p608_p10 }
  0x87   : > { %p615_p2 = por %p614_p1, %p613_p0 }
  0x89   : > { %p616_p3 = pnand %p615_p2, %p609_p11 }
  0x8b   : > { %619 = shalt.err (!%p616_p3)
}
  0x8c   : > { %s675_s30 = smov 128   ;;  %s676_s5 = smov 8  }
  0x8d   : > { %507 = dma.vmem_to_hbm [thread:$0]  (%p732_p7), %s845_s4, 8192, %s840_s12, %s850_s13, %s675_s30, %s675_s30, %s676_s5  }
  0x8e PF: > { %p514_p4 = scmp.ge.s32.totalorder %s662_s21, 1  ;;  %s318_s7 = sand.u32 1, %s654_s19  }
  0x8f   : > { %s319_s8 = scalar_lea.sflag [#allocation7], %s318_s7 }
  0x90   : > { %p510_p5 = pnand %p514_p4, %p736_p9 }
  0x92   : > { %649 = dma.done.wait (!%p510_p5), %s319_s8, 8192  }
  0x93   : > { %651 = vsyncadd (!%p510_p5), %s319_s8, 4294959104  ;;  %p16_p6 = scmp.ge.s32.totalorder %s721_s22, 3   ;;  %s893_s19 = smov %s658_s20 }
  0x94   : > { %s894_s20 = smov %s730_s25  ;;  %s895_s21 = smov %s721_s22 }
  0x95   :  { %18 = sbr.rel (!%p16_p6) target bundleno = 15 (0xf), region = 108 }
  0x9c   :  { %324 = vsyncpa [#allocation7], 1 }
  0x9d   :  { %326 = vsyncpa [#allocation7 + $0x1], 1 }
  0x9e   :  { %327 = vsyncmov [#allocation3] }
  0xa1   :  { %s328_s21 = vpop.sfrf %327 }
  0xa2   :  { %p488_p7 = scmp.ne.s32.totalorder %s328_s21, 0 }
  0xa4   :  { %332 = shalt.err (%p488_p7)  }
  0xa5   :  { %334 = vsyncmov [#allocation3 + $0x1] }
  0xa8   :  { %s335_s26 = vpop.sfrf %334 }
  0xa9   :  { %p489_p9 = scmp.ne.s32.totalorder %s335_s26, 0 }
  0xab   :  { %339 = shalt.err (%p489_p9)  }
  0xac   :  { %341 = vsyncmov [#allocation3 + $0x2] }
  0xaf   :  { %s342_s27 = vpop.sfrf %341 }
  0xb0   :  { %p490_p8 = scmp.ne.s32.totalorder %s342_s27, 0 }
  0xb2   :  { %346 = shalt.err (%p490_p8)  }
  0xb3   :  { %348 = vsyncmov [#allocation3 + $0x3] }
  0xb6   :  { %s349_s9 = vpop.sfrf %348 }
  0xb7   :  { %p491_p10 = scmp.ne.s32.totalorder %s349_s9, 0 }
  0xb9   :  { %353 = shalt.err (%p491_p10)  }
  0xba   :  { %355 = vsyncmov [#allocation3 + $0x4] }
  0xbd   :  { %s356_s22 = vpop.sfrf %355 }
  0xbe   :  { %p492_p11 = scmp.ne.s32.totalorder %s356_s22, 0 }
  0xc0   :  { %360 = shalt.err (%p492_p11)  }
  0xc1   :  { %362 = vsyncmov [#allocation3 + $0x5] }
  0xc4   :  { %s363_s1 = vpop.sfrf %362 }
  0xc5   :  { %p493_p13 = scmp.ne.s32.totalorder %s363_s1, 0 }
  0xc7   :  { %367 = shalt.err (%p493_p13)  }
  0xc8   :  { %369 = vsyncmov [#allocation3 + $0x6] }
  0xcb   :  { %s370_s2 = vpop.sfrf %369 }
  0xcc   :  { %p494_p12 = scmp.ne.s32.totalorder %s370_s2, 0 }
  0xce   :  { %374 = shalt.err (%p494_p12)  }
  0xcf   :  { %376 = vsyncmov [#allocation3 + $0x7] }
  0xd2   :  { %s377_s19 = vpop.sfrf %376 }
  0xd3   :  { %p495_p0 = scmp.ne.s32.totalorder %s377_s19, 0 }
  0xd5   :  { %381 = shalt.err (%p495_p0)  }
  0xd6   :  { %383 = vsyncmov [#allocation3 + $0x8] }
  0xd9   :  { %s384_s20 = vpop.sfrf %383 }
  0xda   :  { %p496_p1 = scmp.ne.s32.totalorder %s384_s20, 0 }
  0xdc   :  { %388 = shalt.err (%p496_p1)  }
  0xdd   :  { %390 = vsyncmov [#allocation3 + $0x9] }
  0xe0   :  { %s391_s25 = vpop.sfrf %390 }
  0xe1   :  { %p497_p2 = scmp.ne.s32.totalorder %s391_s25, 0 }
  0xe3   :  { %395 = shalt.err (%p497_p2)  }
  0xe4   :  { %397 = vsyncmov [#allocation3 + $0xa] }
  0xe7   :  { %s398_s11 = vpop.sfrf %397 }
  0xe8   :  { %p498_p3 = scmp.ne.s32.totalorder %s398_s11, 0 }
  0xea   :  { %402 = shalt.err (%p498_p3)  }
  0xeb   :  { %404 = vsyncmov [#allocation3 + $0xb] }
  0xee   :  { %s405_s29 = vpop.sfrf %404 }
  0xef   :  { %p499_p4 = scmp.ne.s32.totalorder %s405_s29, 0 }
  0xf1   :  { %409 = shalt.err (%p499_p4)  }
  0xf2   :  { %411 = vsyncmov [#allocation3 + $0xc] }
  0xf5   :  { %s412_s4 = vpop.sfrf %411 }
  0xf6   :  { %p500_p5 = scmp.ne.s32.totalorder %s412_s4, 0 }
  0xf8   :  { %416 = shalt.err (%p500_p5)  }
  0xf9   :  { %418 = vsyncmov [#allocation3 + $0xd] }
  0xfc   :  { %s419_s6 = vpop.sfrf %418 }
  0xfd   :  { %p501_p6 = scmp.ne.s32.totalorder %s419_s6, 0 }
  0xff   :  { %423 = shalt.err (%p501_p6)  }
 0x100   :  { %425 = vsyncmov [#allocation3 + $0xe] }
 0x103   :  { %s426_s10 = vpop.sfrf %425 }
 0x104   :  { %p502_p7 = scmp.ne.s32.totalorder %s426_s10, 0 }
 0x106   :  { %430 = shalt.err (%p502_p7)  }
 0x107   :  { %432 = vsyncmov [#allocation3 + $0xf] }
 0x10a   :  { %s433_s12 = vpop.sfrf %432 }
 0x10b   :  { %p503_p9 = scmp.ne.s32.totalorder %s433_s12, 0 }
 0x10d   :  { %437 = shalt.err (%p503_p9)  }

</bundles_post_ra>
